<compile_context>
chip_gen: v7x
topology: tpu7x:2x2x1
jax: 0.10.0
libtpu: 0.0.40
codegen_flags: <defaults>
</compile_context>

<pallas_src>
import functools

import jax
import jax.numpy as jnp
from jax.experimental import pallas as pl
from jax.experimental.pallas import tpu as pltpu

IN_FEATURES = 28 * 28   # 784
HIDDEN = 128
OUT_FEATURES = 10
OUT_PAD = 128           # lane-dense padded output width
TILE_B = 1024           # batch tile (multiple of 8); ~4.5 MiB VMEM live


def _round_up(x, m):
    return (x + m - 1) // m * m


def simple_nn_kernel(x_ref, w1_ref, b1_ref, w2_ref, b2_ref, o_ref):
    # x_ref : (TB, 784)  bf16      w1_ref: (784, 128) bf16   b1_ref: (1, 128) f32
    # w2_ref: (128, 128) bf16 (zero-padded cols 10..127)      b2_ref: (1, 128) f32
    # o_ref : (TB, 128)  f32  (cols 10..127 are padding, sliced off outside)
    x = x_ref[...]

    # fc1 + ReLU (MXU matmul with f32 accumulation; bias-add + max on VPU).
    h = jnp.dot(x, w1_ref[...], preferred_element_type=jnp.float32)
    h = jnp.maximum(h + b1_ref[...], 0.0)

    # fc2 (lane-dense padded N=128).
    y = jnp.dot(h.astype(w2_ref.dtype), w2_ref[...],
                preferred_element_type=jnp.float32)
    y = y + b2_ref[...]

    o_ref[...] = y.astype(o_ref.dtype)


@functools.partial(jax.jit, static_argnames=())
def simple_nn_forward(x_nchw, w1, b1, w2, b2):
    """x_nchw: (B, 1, 28, 28) float32 -> logits (B, 10) float32."""
    B = x_nchw.shape[0]

    # Glue: flatten like torch .view(-1, 784) and cast the streamed input to
    # bf16 so the HBM array itself is half-width.
    x2d = x_nchw.reshape(B, IN_FEATURES).astype(jnp.bfloat16)

    # Batch tile: multiple of 8; pad B up to a multiple of TB with zero rows.
    TB = min(TILE_B, _round_up(B, 8))
    B_pad = _round_up(B, TB)
    if B_pad != B:
        x2d = jnp.pad(x2d, ((0, B_pad - B), (0, 0)))

    # bf16 weights (f32 accumulation in-kernel); f32 biases.
    w1_b = w1.astype(jnp.bfloat16)                       # (784, 128)
    b1_f = b1.reshape(1, HIDDEN).astype(jnp.float32)     # (1, 128)

    # Zero-pad fc2 to 128 output lanes (lane-dense store / full MXU N dim).
    w2_p = jnp.pad(w2.astype(jnp.bfloat16),
                   ((0, 0), (0, OUT_PAD - OUT_FEATURES)))           # (128, 128)
    b2_p = jnp.pad(b2.reshape(1, OUT_FEATURES).astype(jnp.float32),
                   ((0, 0), (0, OUT_PAD - OUT_FEATURES)))           # (1, 128)

    grid = (B_pad // TB,)

    flops = 2 * B_pad * IN_FEATURES * HIDDEN + 2 * B_pad * HIDDEN * OUT_PAD
    bytes_accessed = (B_pad * IN_FEATURES * 2            # x (bf16)
                      + IN_FEATURES * HIDDEN * 2         # w1 (bf16)
                      + HIDDEN * OUT_PAD * 2             # w2 (bf16)
                      + HIDDEN * 4 + OUT_PAD * 4         # biases (f32)
                      + B_pad * OUT_PAD * 4)             # output (f32)
    cost = pl.CostEstimate(flops=flops, transcendentals=0,
                           bytes_accessed=bytes_accessed)

    out_pad = pl.pallas_call(
        simple_nn_kernel,
        out_shape=jax.ShapeDtypeStruct((B_pad, OUT_PAD), jnp.float32),
        grid=grid,
        in_specs=[
            pl.BlockSpec((TB, IN_FEATURES), lambda i: (i, 0)),      # x tiles
            pl.BlockSpec((IN_FEATURES, HIDDEN), lambda i: (0, 0)),  # w1 resident
            pl.BlockSpec((1, HIDDEN), lambda i: (0, 0)),            # b1 resident
            pl.BlockSpec((HIDDEN, OUT_PAD), lambda i: (0, 0)),      # w2 resident
            pl.BlockSpec((1, OUT_PAD), lambda i: (0, 0)),           # b2 resident
        ],
        out_specs=pl.BlockSpec((TB, OUT_PAD), lambda i: (i, 0)),
        compiler_params=pltpu.CompilerParams(
            dimension_semantics=("parallel",),
            vmem_limit_bytes=32 * 1024 * 1024),
        cost_estimate=cost,
    )(x2d, w1_b, b1_f, w2_p, b2_p)

    # Glue: drop batch padding and the 118 padded output lanes.
    return out_pad[:B, :OUT_FEATURES]


def init_params(key):
    """Deterministic init mimicking PyTorch's default Linear init
    (uniform(-1/sqrt(fan_in), 1/sqrt(fan_in))), weights stored as (in, out)."""
    k1, k2, k3, k4 = jax.random.split(key, 4)
    bound1 = 1.0 / jnp.sqrt(IN_FEATURES)
    bound2 = 1.0 / jnp.sqrt(HIDDEN)
    w1 = jax.random.uniform(k1, (IN_FEATURES, HIDDEN), jnp.float32,
                            -bound1, bound1)
    b1 = jax.random.uniform(k2, (1, HIDDEN), jnp.float32, -bound1, bound1)
    w2 = jax.random.uniform(k3, (HIDDEN, OUT_FEATURES), jnp.float32,
                            -bound2, bound2)
    b2 = jax.random.uniform(k4, (1, OUT_FEATURES), jnp.float32,
                            -bound2, bound2)
    return w1, b1, w2, b2


if __name__ == "__main__":
    key = jax.random.PRNGKey(0)
    kx, kp = jax.random.split(key)

    B = 2
    x = jax.random.normal(kx, (B, 1, 28, 28), dtype=jnp.float32)
    w1, b1, w2, b2 = init_params(kp)

    logits = simple_nn_forward(x, w1, b1, w2, b2)
    jax.block_until_ready(logits)
    assert logits.shape == (B, OUT_FEATURES)

    # Reference in plain JAX using the same bf16-input / f32-accumulate recipe.
    x2d = x.reshape(B, IN_FEATURES).astype(jnp.bfloat16)
    h_ref = jnp.maximum(
        jnp.dot(x2d, w1.astype(jnp.bfloat16),
                preferred_element_type=jnp.float32) + b1, 0.0)
    ref = jnp.dot(h_ref.astype(jnp.bfloat16), w2.astype(jnp.bfloat16),
                  preferred_element_type=jnp.float32) + b2

    assert jnp.allclose(logits, ref, atol=1e-2, rtol=1e-2), (
        f"max abs err = {jnp.max(jnp.abs(logits - ref))}")

    print("KERNEL_OK")
</pallas_src>

<mosaic_0001>
module attributes {stable_mosaic.version = 11 : i64} {
  func.func @simple_nn_kernel(%arg0: i32, %arg1: memref<8x784xbf16, #tpu.memory_space<vmem>>, %arg2: memref<784x128xbf16, #tpu.memory_space<vmem>>, %arg3: memref<1x128xf32, #tpu.memory_space<vmem>>, %arg4: memref<128x128xbf16, #tpu.memory_space<vmem>>, %arg5: memref<1x128xf32, #tpu.memory_space<vmem>>, %arg6: memref<8x128xf32, #tpu.memory_space<vmem>>) attributes {dimension_semantics = [#tpu.dimension_semantics<parallel>], iteration_bounds = array<i64: 1>, scalar_prefetch = 0 : i64, scratch_operands = 0 : i64, tpu.core_type = #tpu.core_type<tc>, window_params = [{transform_indices = @transform_0, window_bounds = array<i64: 8, 784>}, {pipeline_mode = #tpu.pipeline_mode<synchronous>, transform_indices = @transform_1, window_bounds = array<i64: 784, 128>}, {pipeline_mode = #tpu.pipeline_mode<synchronous>, transform_indices = @transform_2, window_bounds = array<i64: 1, 128>}, {pipeline_mode = #tpu.pipeline_mode<synchronous>, transform_indices = @transform_3, window_bounds = array<i64: 128, 128>}, {pipeline_mode = #tpu.pipeline_mode<synchronous>, transform_indices = @transform_4, window_bounds = array<i64: 1, 128>}, {transform_indices = @transform_5, window_bounds = array<i64: 8, 128>}]} {
    %c0 = arith.constant 0 : index
    %c0_0 = arith.constant 0 : index
    %0 = vector.load %arg1[%c0, %c0_0] : memref<8x784xbf16, #tpu.memory_space<vmem>>, vector<8x784xbf16>
    %c0_1 = arith.constant 0 : index
    %c0_2 = arith.constant 0 : index
    %1 = vector.load %arg2[%c0_1, %c0_2] : memref<784x128xbf16, #tpu.memory_space<vmem>>, vector<784x128xbf16>
    %cst = arith.constant dense<0.000000e+00> : vector<8x128xf32>
    %2 = tpu.matmul %0, %1, %cst {dimension_numbers = #tpu.dot_dimension_numbers<[1], [0], [0], [1], [0, 0, 1, 1], [], []>} : vector<8x784xbf16>, vector<784x128xbf16>, vector<8x128xf32> -> vector<8x128xf32>
    %c0_3 = arith.constant 0 : index
    %c0_4 = arith.constant 0 : index
    %3 = vector.load %arg3[%c0_3, %c0_4] : memref<1x128xf32, #tpu.memory_space<vmem>>, vector<1x128xf32>
    %4 = vector.broadcast %3 : vector<1x128xf32> to vector<8x128xf32>
    %5 = arith.addf %2, %4 : vector<8x128xf32>
    %cst_5 = arith.constant 0.000000e+00 : f32
    %6 = vector.broadcast %cst_5 : f32 to vector<8x128xf32>
    %7 = arith.maximumf %5, %6 : vector<8x128xf32>
    %8 = arith.truncf %7 : vector<8x128xf32> to vector<8x128xbf16>
    %c0_6 = arith.constant 0 : index
    %c0_7 = arith.constant 0 : index
    %9 = vector.load %arg4[%c0_6, %c0_7] : memref<128x128xbf16, #tpu.memory_space<vmem>>, vector<128x128xbf16>
    %cst_8 = arith.constant dense<0.000000e+00> : vector<8x128xf32>
    %10 = tpu.matmul %8, %9, %cst_8 {dimension_numbers = #tpu.dot_dimension_numbers<[1], [0], [0], [1], [0, 0, 1, 1], [], []>} : vector<8x128xbf16>, vector<128x128xbf16>, vector<8x128xf32> -> vector<8x128xf32>
    %c0_9 = arith.constant 0 : index
    %c0_10 = arith.constant 0 : index
    %11 = vector.load %arg5[%c0_9, %c0_10] : memref<1x128xf32, #tpu.memory_space<vmem>>, vector<1x128xf32>
    %12 = vector.broadcast %11 : vector<1x128xf32> to vector<8x128xf32>
    %13 = arith.addf %10, %12 : vector<8x128xf32>
    %c0_11 = arith.constant 0 : index
    %c0_12 = arith.constant 0 : index
    %14 = vector.load %arg6[%c0_11, %c0_12] : memref<8x128xf32, #tpu.memory_space<vmem>>, vector<8x128xf32>
    tpu.vector_store %arg6[%c0_11, %c0_12], %13 {strides = array<i32>} : memref<8x128xf32, #tpu.memory_space<vmem>>, vector<8x128xf32>,
    return
  }
  func.func @transform_0(%arg0: i32) -> (i32, i32) {
    %c0_i32 = arith.constant 0 : i32
    %c0_i32_0 = arith.constant 0 : i32
    return %arg0, %c0_i32 : i32, i32
  }
  func.func @transform_1(%arg0: i32) -> (i32, i32) {
    %c0_i32 = arith.constant 0 : i32
    %c0_i32_0 = arith.constant 0 : i32
    %c0_i32_1 = arith.constant 0 : i32
    return %c0_i32, %c0_i32_0 : i32, i32
  }
  func.func @transform_2(%arg0: i32) -> (i32, i32) {
    %c0_i32 = arith.constant 0 : i32
    %c0_i32_0 = arith.constant 0 : i32
    %c0_i32_1 = arith.constant 0 : i32
    return %c0_i32, %c0_i32_0 : i32, i32
  }
  func.func @transform_3(%arg0: i32) -> (i32, i32) {
    %c0_i32 = arith.constant 0 : i32
    %c0_i32_0 = arith.constant 0 : i32
    %c0_i32_1 = arith.constant 0 : i32
    return %c0_i32, %c0_i32_0 : i32, i32
  }
  func.func @transform_4(%arg0: i32) -> (i32, i32) {
    %c0_i32 = arith.constant 0 : i32
    %c0_i32_0 = arith.constant 0 : i32
    %c0_i32_1 = arith.constant 0 : i32
    return %c0_i32, %c0_i32_0 : i32, i32
  }
  func.func @transform_5(%arg0: i32) -> (i32, i32) {
    %c0_i32 = arith.constant 0 : i32
    %c0_i32_0 = arith.constant 0 : i32
    return %arg0, %c0_i32 : i32, i32
  }
}

</mosaic_0001>

<bundles_post_ra>
// kernel: simple_nn_forward.1
= control target key start
LH: loop header
LB: loop body
LE: loop exit
PB: predicated region body
PF: predicated region fallthrough
CT: control target
= control target key end

     0   :  { %v966_v41 = vmov 0.0   ;;  %vm967_vm0 = vmmov 0   ;;  %vm448_vm1 = vcmask 130048   ;;  %s1203_s1 = inlined_call_operand.vmem [shape: bf16[784,128], index: 1, kind: input, shape index: {}]   ;;  %s1204_s0 = inlined_call_operand.vmem [shape: bf16[8,784], index: 0, kind: input, shape index: {}]   ;;  %s1205_s3 = inlined_call_operand.vmem [shape: bf16[128,128], index: 3, kind: input, shape index: {}]   ;;  %s1206_s2 = inlined_call_operand.vmem [shape: f32[1,128], index: 2, kind: input, shape index: {}]   ;;  %s1207_s4 = inlined_call_operand.vmem [shape: f32[1,128], index: 4, kind: input, shape index: {}]   ;;  %s1208_s5 = inlined_call_operand.vmem [shape: f32[8,128], index: 5, kind: output, shape index: {}]  }
   0x1   :  { %v902_v0 = vld [vmem:[%s1203_s1 + $0x40] sm:$0xff]   ;;  %v906_v4 = vld [vmem:[%s1203_s1 + $0x48] sm:$0xff]   ;;  %v910_v8 = vld [vmem:[%s1203_s1 + $0x50] sm:$0xff]  }
   0x2   :  { %v903_v1 = vld [vmem:[%s1203_s1] sm:$0xff]   ;;  %797 = vmatprep.subr.bf16.mxu0 %v902_v0  ;;  %v907_v5 = vld [vmem:[%s1203_s1 + $0x8] sm:$0xff]   ;;  %v911_v9 = vld [vmem:[%s1203_s1 + $0x10] sm:$0xff]  }
   0x3   :  { %v904_v2 = vld [vmem:[%s1203_s1 + $0xc0] sm:$0xff]   ;;  %798 = vmatpush3.bf16.msra.mxu0 %v903_v1  ;;  %v908_v6 = vld [vmem:[%s1203_s1 + $0xc8] sm:$0xff]   ;;  %v912_v10 = vld [vmem:[%s1203_s1 + $0xd0] sm:$0xff]  }
   0x4   :  { %v905_v3 = vld [vmem:[%s1203_s1 + $0x80] sm:$0xff]   ;;  %819 = vmatprep.subr.bf16.mxu1 %v904_v2  ;;  %799 = vmatprep.subr.bf16.mxu0 %v906_v4  ;;  %v909_v7 = vld [vmem:[%s1203_s1 + $0x88] sm:$0xff]   ;;  %v913_v11 = vld [vmem:[%s1203_s1 + $0x90] sm:$0xff]  }
   0x5   :  { %820 = vmatpush3.bf16.msra.mxu1 %v905_v3  ;;  %v914_v12 = vld [vmem:[%s1203_s1 + $0x58] sm:$0xff]   ;;  %v918_v16 = vld [vmem:[%s1203_s1 + $0x60] sm:$0xff]   ;;  %v922_v20 = vld [vmem:[%s1203_s1 + $0x68] sm:$0xff]  }
   0x6   :  { %821 = vmatprep.subr.bf16.mxu1 %v908_v6  ;;  %v915_v13 = vld [vmem:[%s1203_s1 + $0x18] sm:$0xff]   ;;  %v919_v17 = vld [vmem:[%s1203_s1 + $0x20] sm:$0xff]   ;;  %v923_v21 = vld [vmem:[%s1203_s1 + $0x28] sm:$0xff]  }
   0x7   :  { %800 = vmatpush3.bf16.msra.mxu0 %v907_v5  ;;  %v916_v14 = vld [vmem:[%s1203_s1 + $0xd8] sm:$0xff]   ;;  %v920_v18 = vld [vmem:[%s1203_s1 + $0xe0] sm:$0xff]   ;;  %v924_v22 = vld [vmem:[%s1203_s1 + $0xe8] sm:$0xff]  }
   0x8   :  { %801 = vmatprep.subr.bf16.mxu0 %v910_v8  ;;  %v917_v15 = vld [vmem:[%s1203_s1 + $0x98] sm:$0xff]   ;;  %v921_v19 = vld [vmem:[%s1203_s1 + $0xa0] sm:$0xff]   ;;  %v925_v23 = vld [vmem:[%s1203_s1 + $0xa8] sm:$0xff]  }
   0x9   :  { %822 = vmatpush3.bf16.msra.mxu1 %v909_v7  ;;  %v926_v24 = vld [vmem:[%s1203_s1 + $0x70] sm:$0xff]   ;;  %v930_v28 = vld [vmem:[%s1203_s1 + $0x78] sm:$0xff]   ;;  %v21_v31 = vld [vmem:[%s1204_s0] sm:$0xff] }
   0xa   :  { %823 = vmatprep.subr.bf16.mxu1 %v912_v10  ;;  %v927_v25 = vld [vmem:[%s1203_s1 + $0x30] sm:$0xff]   ;;  %v931_v29 = vld [vmem:[%s1203_s1 + $0x38] sm:$0xff]   ;;  %v731_v32 = vcombine.low %v21_v31, %v21_v31  ;;  %v732_v33 = vcombine.high %v21_v31, %v21_v31  ;;  %v937_v35 = vld [vmem:[%s1203_s1 + $0x140] sm:$0xff]  }
   0xb   :  { %802 = vmatpush3.bf16.msra.mxu0 %v911_v9  ;;  %v928_v26 = vld [vmem:[%s1203_s1 + $0xf0] sm:$0xff]   ;;  %v932_v30 = vld [vmem:[%s1203_s1 + $0xf8] sm:$0xff]   ;;  %v22_v36 = vld [vmem:[%s1204_s0 + $0x8] sm:$0xff] }
   0xc   :  { %803 = vmatprep.subr.bf16.mxu0 %v914_v12  ;;  %v929_v27 = vld [vmem:[%s1203_s1 + $0xb0] sm:$0xff]   ;;  %v936_v34 = vld [vmem:[%s1203_s1 + $0xb8] sm:$0xff]   ;;  %484 = vmatprep.mubr.bf16.mxu0 %v732_v33  ;;  %v733_v37 = vcombine.low %v22_v36, %v22_v36  ;;  %v734_v38 = vcombine.high %v22_v36, %v22_v36  ;;  %v940_v39 = vld [vmem:[%s1203_s1 + $0x100] sm:$0xff]  }
   0xd   :  { %824 = vmatpush3.bf16.msra.mxu1 %v913_v11  ;;  %v941_v40 = vld [vmem:[%s1203_s1 + $0x148] sm:$0xff]   ;;  %v943_v43 = vld [vmem:[%s1203_s1 + $0x150] sm:$0xff]   ;;  %v945_v45 = vld [vmem:[%s1203_s1 + $0x158] sm:$0xff]  }
   0xe   :  { %825 = vmatprep.subr.bf16.mxu1 %v916_v14  ;;  %524 = vmatprep.mubr.bf16.mxu1 %v734_v38  ;;  %v942_v42 = vld [vmem:[%s1203_s1 + $0x108] sm:$0xff]   ;;  %v944_v44 = vld [vmem:[%s1203_s1 + $0x110] sm:$0xff]   ;;  %v946_v46 = vld [vmem:[%s1203_s1 + $0x118] sm:$0xff]  }
   0xf   :  { %804 = vmatpush3.bf16.msra.mxu0 %v915_v13  ;;  %v947_v47 = vld [vmem:[%s1203_s1 + $0x160] sm:$0xff]   ;;  %v949_v49 = vld [vmem:[%s1203_s1 + $0x168] sm:$0xff]   ;;  %v23_v51 = vld [vmem:[%s1204_s0 + $0x10] sm:$0xff] }
  0x10   :  { %805 = vmatprep.subr.bf16.mxu0 %v918_v16  ;;  %v948_v48 = vld [vmem:[%s1203_s1 + $0x120] sm:$0xff]   ;;  %v935_v52 = vld [vmem:[%s1204_s0 + $0x18] ss:$0 sps:$4 sm:$0xff]   ;;  %v736_v53 = vcombine.high %v23_v51, %v23_v51  ;;  %v950_v54 = vld [vmem:[%s1203_s1 + $0x128] sm:$0xff]   ;;  %v735_v59 = vcombine.low %v23_v51, %v23_v51 }
  0x11   :  { %826 = vmatpush3.bf16.msra.mxu1 %v917_v15  ;;  %v955_v50 = vld [vmem:[%s1203_s1 + $0x180] sm:$0xff]   ;;  %v951_v55 = vld [vmem:[%s1203_s1 + $0x170] sm:$0xff]   ;;  %v953_v57 = vld [vmem:[%s1203_s1 + $0x178] sm:$0xff]  }
  0x12   :  { %827 = vmatprep.subr.bf16.mxu1 %v920_v18  ;;  %v952_v56 = vld [vmem:[%s1203_s1 + $0x130] sm:$0xff]   ;;  %v954_v58 = vld [vmem:[%s1203_s1 + $0x138] sm:$0xff]   ;;  %v958_v60 = vld [vmem:[%s1205_s3] sm:$0xff]  }
  0x13   :  { %806 = vmatpush3.bf16.msra.mxu0 %v919_v17  ;;  %v959_v61 = vld [vmem:[%s1205_s3 + $0x8] sm:$0xff]   ;;  %v960_v62 = vld [vmem:[%s1205_s3 + $0x10] sm:$0xff]   ;;  %v961_v63 = vld [vmem:[%s1205_s3 + $0x18] sm:$0xff]  }
  0x14   :  { %807 = vmatprep.subr.bf16.mxu0 %v922_v20  ;;  %v962_v0 = vld [vmem:[%s1205_s3 + $0x20] sm:$0xff]   ;;  %v963_v1 = vld [vmem:[%s1205_s3 + $0x28] sm:$0xff]   ;;  %v964_v2 = vld [vmem:[%s1205_s3 + $0x30] sm:$0xff]  }
  0x15   :  { %828 = vmatpush3.bf16.msra.mxu1 %v921_v19  ;;  %v965_v3 = vld [vmem:[%s1205_s3 + $0x38] sm:$0xff]   ;;  %v730_v5 = vld [vmem:[%s1206_s2] ss:$0 sm:$0xff] }
  0x16   :  { %829 = vmatprep.subr.bf16.mxu1 %v924_v22 }
  0x17   :  { %808 = vmatpush3.bf16.msra.mxu0 %v923_v21 }
  0x18   :  { %809 = vmatprep.subr.bf16.mxu0 %v926_v24 }
  0x19   :  { %830 = vmatpush3.bf16.msra.mxu1 %v925_v23 }
  0x1a   :  { %831 = vmatprep.subr.bf16.mxu1 %v928_v26 }
  0x1b   :  { %810 = vmatpush3.bf16.msra.mxu0 %v927_v25 }
  0x1c   :  { %811 = vmatprep.subr.bf16.mxu0 %v930_v28 }
  0x1d   :  { %832 = vmatpush3.bf16.msra.mxu1 %v929_v27 }
  0x1e   :  { %833 = vmatprep.subr.bf16.mxu1 %v932_v30  ;;  %v788_v30 = vld [vmem:[%s1207_s4] ss:$0 sm:$0xff] }
  0x1f   :  { %812 = vmatpush3.bf16.msra.mxu0 %v931_v29 }
  0x20   :  { %841 = vmatprep.subr.bf16.mxu0 %v937_v35 }
  0x21   :  { %834 = vmatpush3.bf16.msra.mxu1 %v936_v34 }
  0x22   :  { %485 = vmatmul.mubr.bf16.vlgmr.msra.gmra.mrb[0].mxu0 %v731_v32  ;;  %874 = vmatprep.subr.bf16.mxu1 %v966_v41 }
  0x23   :  { %842 = vmatpush3.bf16.msra.mxu0 %v940_v39  ;;  %564 = vmatprep.mubr.bf16.mxu0 %v736_v53 }
  0x24   :  { %525 = vmatmul.mubr.bf16.vlgmr.msra.gmra.mrb[0].mxu1 %v733_v37  ;;  %843 = vmatprep.subr.bf16.mxu0 %v941_v40 }
  0x25   :  { %876 = vmatprep.mubr.msk.bf16.mxu1 %vm967_vm0, %v966_v41  ;;  %875 = vmatpush3.bf16.msra.mxu1 %v955_v50 }
  0x26   :  { %880 = vmatprep.subr.bf16.mxu1 %v966_v41 }
  0x27   :  { %844 = vmatpush3.bf16.msra.mxu0 %v942_v42 }
  0x28   :  { %845 = vmatprep.subr.bf16.mxu0 %v943_v43 }
  0x2b   :  { %846 = vmatpush3.bf16.msra.mxu0 %v944_v44 }
  0x2c   :  { %847 = vmatprep.subr.bf16.mxu0 %v945_v45  ;;  %877 = vmatmul.mubr.msk.bf16.vlgmr.msra.gmra.mrb[4].mxu1 %vm448_vm1, %v935_v52 }
  0x2d   :  { %896 = vmatprep.mubr.msk.bf16.mxu1 %vm967_vm0, %v966_v41  ;;  %881 = vmatpush3.bf16.msra.mxu1 %v958_v60 }
  0x2e   :  { %882 = vmatprep.subr.bf16.mxu1 %v966_v41 }
  0x2f   :  { %848 = vmatpush3.bf16.msra.mxu0 %v946_v46 }
  0x30   :  { %849 = vmatprep.subr.bf16.mxu0 %v947_v47 }
  0x31   :  { %883 = vmatpush3.bf16.msra.mxu1 %v959_v61 }
  0x32   :  { %884 = vmatprep.subr.bf16.mxu1 %v966_v41 }
  0x33   :  { %850 = vmatpush3.bf16.msra.mxu0 %v948_v48 }
  0x34   :  { %851 = vmatprep.subr.bf16.mxu0 %v949_v49 }
  0x35   :  { %885 = vmatpush3.bf16.msra.mxu1 %v960_v62 }
  0x36   :  { %886 = vmatprep.subr.bf16.mxu1 %v966_v41 }
  0x37   :  { %852 = vmatpush3.bf16.msra.mxu0 %v950_v54 }
  0x38   :  { %853 = vmatprep.subr.bf16.mxu0 %v951_v55 }
  0x39   :  { %887 = vmatpush3.bf16.msra.mxu1 %v961_v63 }
  0x3a   :  { %888 = vmatprep.subr.bf16.mxu1 %v966_v41 }
  0x3b   :  { %854 = vmatpush3.bf16.msra.mxu0 %v952_v56 }
  0x3c   :  { %855 = vmatprep.subr.bf16.mxu0 %v953_v57 }
  0x3d   :  { %889 = vmatpush3.bf16.msra.mxu1 %v962_v0 }
  0x3e   :  { %890 = vmatprep.subr.bf16.mxu1 %v966_v41 }
  0x3f   :  { %856 = vmatpush3.bf16.msra.mxu0 %v954_v58 }
  0x41   :  { %891 = vmatpush3.bf16.msra.mxu1 %v963_v1 }
  0x42   :  { %565 = vmatmul.mubr.bf16.vlgmr.msra.gmra.mrb[4].mxu0 %v735_v59  ;;  %892 = vmatprep.subr.bf16.mxu1 %v966_v41 }
  0x45   :  { %893 = vmatpush3.bf16.msra.mxu1 %v964_v2 }
  0x46   :  { %894 = vmatprep.subr.bf16.mxu1 %v966_v41 }
  0x49   :  { %895 = vmatpush3.bf16.msra.mxu1 %v965_v3 }
  0xf5   :  { %v813_v4 = vpop.f32.mrb[0].mxu0 }
  0xf6   :  { %v814_v6 = vpop.f32.mrb[1].mxu0 }
  0xf7   :  { %v815_v7 = vadd.f32 %v814_v6, %v813_v4  ;;  %v816_v8 = vpop.f32.mrb[2].mxu0  ;;  %v835_v9 = vpop.f32.mrb[0].mxu1 }
  0xf8   :  { %v817_v10 = vpop.f32.mrb[3].mxu0  ;;  %v836_v12 = vpop.f32.mrb[1].mxu1 }
  0xf9   :  { %v487_v11 = vadd.f32 %v815_v7, %v730_v5  ;;  %v837_v13 = vadd.f32 %v836_v12, %v835_v9  ;;  %v838_v14 = vpop.f32.mrb[2].mxu1 }
  0xfa   :  { %v839_v15 = vpop.f32.mrb[3].mxu1 }
  0xfb   :  { %v527_v16 = vadd.f32 %v837_v13, %v487_v11 }
  0xff   :  { %v606_v17 = vpop.f32.mrb[4].mxu1 }
 0x100   :  { %v878_v18 = vpop.f32.mrb[5].mxu1 }
 0x101   :  { %v609_v19 = vpop.f32.mrb[6].mxu1 }
 0x102   :  { %v879_v20 = vpop.f32.mrb[7].mxu1 }
 0x115   :  { %v857_v21 = vpop.f32.mrb[4].mxu0 }
 0x116   :  { %v858_v22 = vpop.f32.mrb[5].mxu0 }
 0x117   :  { %v859_v23 = vadd.f32 %v858_v22, %v857_v21  ;;  %v860_v24 = vpop.f32.mrb[6].mxu0 }
 0x118   :  { %v861_v25 = vpop.f32.mrb[7].mxu0 }
 0x119   :  { %v567_v26 = vadd.f32 %v859_v23, %v527_v16 }
 0x11b   :  { %v607_v27 = vadd.f32 %v606_v17, %v567_v26 }
 0x11d   :  { %v612_v28 = vmax.f32 %v607_v27, 0.0 }
 0x11f   :  { %v613_v29 = vpack.c.bf16 %v612_v28, %v612_v28 }
 0x121   :  { %897 = vmatmul.mubr.bf16.vlgmr.msra.gmra.mrb[8].mxu1 %v613_v29 }
 0x1f4   :  { %v719_v31 = vpop.f32.mrb[8].mxu1 }
 0x1f5   :  { %v720_v32 = vadd.f32 %v788_v30, %v719_v31  ;;  %v898_v33 = vpop.f32.mrb[9].mxu1 }
 0x1f6   :  { %v722_v34 = vpop.f32.mrb[10].mxu1 }
 0x1f7   :  { %725 = vst [vmem:[%s1208_s5] sm:$0xff] %v720_v32  ;;  %v899_v35 = vpop.f32.mrb[11].mxu1 }

</bundles_post_ra>
